<compile_context>
chip_gen: v7x
topology: tpu7x:2x2x1
jax: 0.10.0
libtpu: 0.0.40
codegen_flags: <defaults>
</compile_context>

<pallas_src>
import jax
import jax.numpy as jnp
from jax.experimental import pallas as pl
from jax.experimental.pallas import tpu as pltpu


def patch_embed_kernel(p_ref, w_ref, pos_ref, o_ref):
    """One M-tile: (tm, K) @ (K, E) on the MXU (f32 acc) + resident pos add.

    p_ref:   (tm, K)  patch rows (row 0 of each batch is all-zero -> cls slot)
    w_ref:   (K, E)   conv weight as a matmul operand, resident across grid
    pos_ref: (tm, E)  f32 pos table (+bias, +cls) for the tile, resident
    o_ref:   (tm, E)  output tile
    """
    proj = jnp.dot(p_ref[...], w_ref[...], preferred_element_type=jnp.float32)
    o_ref[...] = (proj + pos_ref[...]).astype(o_ref.dtype)


def _choose_bb(B, rows_per_batch, max_rows, target_rows):
    """Pick bb = whole batches per M-tile.

    Legality: bb divides B and either bb*rows_per_batch % 8 == 0 (sublane
    aligned) or bb == B (block == full extent).  Among legal candidates:
      (1) drop those whose rows exceed the VMEM row budget (v7x: 64 MiB VMEM),
      (2) prefer bb < B so the grid has >= 2 steps (lets ("parallel",) shard
          the M axis across v7x's two TensorCores),
      (3) take the largest tile not exceeding target_rows to amortize the
          ~0.35 us per-grid-step overhead.
    """
    cands = [bb for bb in range(1, B + 1)
             if B % bb == 0 and ((bb * rows_per_batch) % 8 == 0 or bb == B)]
    fitting = [bb for bb in cands if bb * rows_per_batch <= max_rows] or [min(cands)]
    multi = [bb for bb in fitting if bb < B]
    pool = multi or fitting
    under = [bb for bb in pool if bb * rows_per_batch <= target_rows]
    return max(under) if under else min(pool)


def patch_embedding(x, conv_weight, conv_bias, class_token, pos_embedding,
                    patch_size, *, compute_dtype=None, out_dtype=None,
                    target_rows=2048, vmem_block_budget=36 * 1024 * 1024,
                    buffer_depth=None):
    """Forward of Spikeformer PatchEmbedding.  x: (B, C, H, W) -> (B, N+1, E).

    compute_dtype: cast matmul operands (e.g. jnp.bfloat16); f32 accumulation.
    out_dtype:     output dtype (defaults to x.dtype); bf16 halves stores.
    buffer_depth:  optional pipeline depth (pl.Buffered) for the patch rows.
    """
    B, C, H, W = x.shape
    P = patch_size
    assert H % P == 0 and W % P == 0, "spatial dims must be divisible by patch"
    GH, GW = H // P, W // P
    N = GH * GW
    Np1 = N + 1
    E = conv_weight.shape[0]
    K = C * P * P

    in_dtype = compute_dtype if compute_dtype is not None else x.dtype
    out_dtype = out_dtype if out_dtype is not None else x.dtype

    # ---- operand construction (fusible into the pallas_call operands via
    #      allow_input_fusion; nothing is zero-padded along K or E) ----------
    # Patchify with element order (c, ph, pw) to match Conv2d weights and
    # patch order (gh, gw) to match flatten(2).  A zero row is prepended per
    # batch so the class-token slot falls out of the same matmul (0 @ W = 0)
    # and the kernel writes the full (B*(N+1), E) result — no concat pass.
    patches = (x.reshape(B, C, GH, P, GW, P)
                 .transpose(0, 2, 4, 1, 3, 5)
                 .reshape(B, N, K))
    patches = jnp.pad(patches, ((0, 0), (1, 0), (0, 0)))       # (B, N+1, K)
    patches = patches.reshape(B * Np1, K).astype(in_dtype)

    w2d = conv_weight.reshape(E, K).T.astype(in_dtype)          # (K, E)

    # Pos table in f32: row 0 = cls + pos[0]; rows 1..N = pos[i] + conv bias.
    pos = pos_embedding.reshape(Np1, E).astype(jnp.float32)
    pos_ext = jnp.concatenate(
        [pos[0:1] + class_token.reshape(1, E).astype(jnp.float32),
         pos[1:] + conv_bias.reshape(1, E).astype(jnp.float32)], axis=0)

    # ---- M-axis tiling under an explicit VMEM budget ------------------------
    M = B * Np1
    in_item = jnp.dtype(in_dtype).itemsize
    out_item = jnp.dtype(out_dtype).itemsize
    n_in_buf = buffer_depth if buffer_depth is not None else 2
    w_bytes = K * E * in_item
    bytes_per_row = n_in_buf * K * in_item + 2 * E * out_item + E * 4
    max_rows = max(Np1, (vmem_block_budget - w_bytes) // bytes_per_row)
    bb = _choose_bb(B, Np1, max_rows, target_rows)
    tm = bb * Np1
    grid = (M // tm,)

    # Replicate the tiny (N+1, E) pos table over the tile's bb batches
    # (resident block, loaded once).  Doing the broadcast in-kernel instead
    # would need a (tm,E) <-> (bb,N+1,E) reshape, which relayouts sublanes
    # whenever (N+1) % 8 != 0; the bb-fold copy is far cheaper and fusible.
    pos_tile = jnp.tile(pos_ext, (bb, 1))                       # (tm, E), f32

    patches_spec_kwargs = {}
    if buffer_depth is not None and buffer_depth != 2:
        patches_spec_kwargs["pipeline_mode"] = pl.Buffered(buffer_depth)
    patches_spec = pl.BlockSpec((tm, K), lambda i: (i, 0), **patches_spec_kwargs)

    out2d = pl.pallas_call(
        patch_embed_kernel,
        out_shape=jax.ShapeDtypeStruct((M, E), out_dtype),
        grid_spec=pltpu.PrefetchScalarGridSpec(
            num_scalar_prefetch=0,
            grid=grid,
            in_specs=[
                patches_spec,                                   # streamed rows
                pl.BlockSpec((K, E), lambda i: (0, 0)),         # weight, resident
                pl.BlockSpec((tm, E), lambda i: (0, 0)),        # pos, resident
            ],
            out_specs=pl.BlockSpec((tm, E), lambda i: (i, 0)),
        ),
        compiler_params=pltpu.CompilerParams(
            dimension_semantics=("parallel",),
            vmem_limit_bytes=48 * 1024 * 1024,     # blocks capped well below
            allow_input_fusion=[True, True, True],  # fuse patchify/cast/tile
        ),
        cost_estimate=pl.CostEstimate(
            flops=2 * M * K * E,
            transcendentals=0,
            bytes_accessed=(M * K * in_item + K * E * in_item
                            + tm * E * 4 + M * E * out_item),
        ),
    )(patches, w2d, pos_tile)

    # Leading-dim reshape only (free); dropout is identity (eval semantics).
    return out2d.reshape(B, Np1, E)


def _reference(x, conv_weight, conv_bias, class_token, pos_embedding, P):
    """Pure-JAX reference (Conv2d stride=P kernel=P -> flatten -> cat -> +pos)."""
    B = x.shape[0]
    y = jax.lax.conv_general_dilated(
        x, conv_weight, window_strides=(P, P), padding="VALID",
        dimension_numbers=("NCHW", "OIHW", "NCHW"))
    y = y + conv_bias.reshape(1, -1, 1, 1)
    B_, E, GH, GW = y.shape
    y = y.reshape(B_, E, GH * GW).transpose(0, 2, 1)            # (B, N, E)
    cls = jnp.broadcast_to(class_token, (B, 1, E))
    y = jnp.concatenate([cls, y], axis=1)                       # (B, N+1, E)
    y = y + pos_embedding
    return y


if __name__ == "__main__":
    # Small shapes consistent with the module: B=2, C=4, img=16, patch=4, E=32.
    B, C, IMG, P, E = 2, 4, 16, 4, 32
    N = (IMG // P) ** 2

    key = jax.random.PRNGKey(0)
    kx, kw, kb, kc, kp = jax.random.split(key, 5)

    x = jax.random.normal(kx, (B, C, IMG, IMG), dtype=jnp.float32)
    conv_weight = jax.random.normal(kw, (E, C, P, P), dtype=jnp.float32) * 0.05
    conv_bias = jax.random.normal(kb, (E,), dtype=jnp.float32) * 0.05
    class_token = jax.random.normal(kc, (1, 1, E), dtype=jnp.float32) * 0.02
    pos_embedding = jax.random.normal(kp, (1, N + 1, E), dtype=jnp.float32) * 0.02

    ref = _reference(x, conv_weight, conv_bias, class_token, pos_embedding, P)

    # f32 MXU path (strict check).  jit so allow_input_fusion can act on the
    # patchify / cast / tile producers.
    fwd_f32 = jax.jit(lambda x_, w_, b_, c_, p_: patch_embedding(
        x_, w_, b_, c_, p_, P))
    out = jax.block_until_ready(fwd_f32(x, conv_weight, conv_bias,
                                        class_token, pos_embedding))
    assert out.shape == (B, N + 1, E), out.shape
    assert jnp.allclose(out, ref, atol=1e-5, rtol=1e-5), \
        float(jnp.max(jnp.abs(out - ref)))

    # bf16 compute + bf16 output path (halves streamed + stored bytes).
    fwd_bf16 = jax.jit(lambda x_, w_, b_, c_, p_: patch_embedding(
        x_, w_, b_, c_, p_, P,
        compute_dtype=jnp.bfloat16, out_dtype=jnp.bfloat16))
    out_bf16 = jax.block_until_ready(fwd_bf16(x, conv_weight, conv_bias,
                                              class_token, pos_embedding))
    assert out_bf16.dtype == jnp.bfloat16
    assert jnp.allclose(out_bf16.astype(jnp.float32), ref, atol=5e-2, rtol=5e-2), \
        float(jnp.max(jnp.abs(out_bf16.astype(jnp.float32) - ref)))

    print("KERNEL_OK")
</pallas_src>

<mosaic_0001>
module attributes {stable_mosaic.version = 11 : i64} {
  func.func @patch_embed_kernel(%arg0: i32, %arg1: memref<34x64xf32, #tpu.memory_space<vmem>>, %arg2: memref<64x32xf32, #tpu.memory_space<vmem>>, %arg3: memref<34x32xf32, #tpu.memory_space<vmem>>, %arg4: memref<34x32xf32, #tpu.memory_space<vmem>>) attributes {dimension_semantics = [#tpu.dimension_semantics<parallel>], iteration_bounds = array<i64: 1>, scalar_prefetch = 0 : i64, scratch_operands = 0 : i64, tpu.core_type = #tpu.core_type<tc>, window_params = [{transform_indices = @transform_0, window_bounds = array<i64: 34, 64>}, {pipeline_mode = #tpu.pipeline_mode<synchronous>, transform_indices = @transform_1, window_bounds = array<i64: 64, 32>}, {pipeline_mode = #tpu.pipeline_mode<synchronous>, transform_indices = @transform_2, window_bounds = array<i64: 34, 32>}, {transform_indices = @transform_3, window_bounds = array<i64: 34, 32>}]} {
    %c0 = arith.constant 0 : index
    %c0_0 = arith.constant 0 : index
    %0 = vector.load %arg1[%c0, %c0_0] : memref<34x64xf32, #tpu.memory_space<vmem>>, vector<34x64xf32>
    %c0_1 = arith.constant 0 : index
    %c0_2 = arith.constant 0 : index
    %1 = vector.load %arg2[%c0_1, %c0_2] : memref<64x32xf32, #tpu.memory_space<vmem>>, vector<64x32xf32>
    %cst = arith.constant dense<0.000000e+00> : vector<34x32xf32>
    %2 = tpu.matmul %0, %1, %cst {dimension_numbers = #tpu.dot_dimension_numbers<[1], [0], [0], [1], [0, 0, 1, 1], [], []>} : vector<34x64xf32>, vector<64x32xf32>, vector<34x32xf32> -> vector<34x32xf32>
    %c0_3 = arith.constant 0 : index
    %c0_4 = arith.constant 0 : index
    %3 = vector.load %arg3[%c0_3, %c0_4] : memref<34x32xf32, #tpu.memory_space<vmem>>, vector<34x32xf32>
    %4 = arith.addf %2, %3 : vector<34x32xf32>
    %c0_5 = arith.constant 0 : index
    %c0_6 = arith.constant 0 : index
    %5 = vector.load %arg4[%c0_5, %c0_6] : memref<34x32xf32, #tpu.memory_space<vmem>>, vector<34x32xf32>
    tpu.vector_store %arg4[%c0_5, %c0_6], %4 {strides = array<i32>} : memref<34x32xf32, #tpu.memory_space<vmem>>, vector<34x32xf32>,
    return
  }
  func.func @transform_0(%arg0: i32) -> (i32, i32) {
    %c0_i32 = arith.constant 0 : i32
    %c0_i32_0 = arith.constant 0 : i32
    return %arg0, %c0_i32 : i32, i32
  }
  func.func @transform_1(%arg0: i32) -> (i32, i32) {
    %c0_i32 = arith.constant 0 : i32
    %c0_i32_0 = arith.constant 0 : i32
    %c0_i32_1 = arith.constant 0 : i32
    return %c0_i32, %c0_i32_0 : i32, i32
  }
  func.func @transform_2(%arg0: i32) -> (i32, i32) {
    %c0_i32 = arith.constant 0 : i32
    %c0_i32_0 = arith.constant 0 : i32
    %c0_i32_1 = arith.constant 0 : i32
    return %c0_i32, %c0_i32_0 : i32, i32
  }
  func.func @transform_3(%arg0: i32) -> (i32, i32) {
    %c0_i32 = arith.constant 0 : i32
    %c0_i32_0 = arith.constant 0 : i32
    return %arg0, %c0_i32 : i32, i32
  }
}

</mosaic_0001>

<bundles_post_ra>
// kernel: tile.9
= control target key start
LH: loop header
LB: loop body
LE: loop exit
PB: predicated region body
PF: predicated region fallthrough
CT: control target
= control target key end

     0   :  { %vm3_vm0 = vcmask 261120   ;;  %s11_s6 = smov 3  ;;  %s74_s0 = inlined_call_operand.vmem [shape: f32[2,17,32], index: 0, kind: input, shape index: {}]   ;;  %s75_s1 = inlined_call_operand.vmem [shape: f32[34,32], index: 1, kind: output, shape index: {}]  }
   0x1   :  { %v2_v0 = vld [vmem:[%s74_s0] sm:$0xff]   ;;  %v26_v1 = vld [vmem:[%s74_s0 + $0x8] sm:$0xff]  }
   0x2   :  { %v28_v2 = vld [vmem:[%s74_s0 + $0x10] ss:$8 sm:%s11_s6]   ;;  %4 = vst.msk [vmem:[%s75_s1] sm:$0xff] %vm3_vm0, %v2_v0   ;;  %27 = vst.msk [vmem:[%s75_s1 + $0x8] sm:$0xff] %vm3_vm0, %v26_v1  }
   0x3   :  { %29 = vst.msk [vmem:[%s75_s1 + $0x10] sm:$0x3] %vm3_vm0, %v28_v2   ;;  %v30_v3 = vld [vmem:[%s74_s0 + $0x19] sm:$0xff]   ;;  %v32_v4 = vld [vmem:[%s74_s0 + $0x21] sm:$0xff]  }
   0x4   :  { %31 = vst.msk [vmem:[%s75_s1 + $0x12] sm:$0xff] %vm3_vm0, %v30_v3   ;;  %33 = vst.msk [vmem:[%s75_s1 + $0x1a] sm:$0xff] %vm3_vm0, %v32_v4  }

// kernel: _lambda_.1
= control target key start
LH: loop header
LB: loop body
LE: loop exit
PB: predicated region body
PF: predicated region fallthrough
CT: control target
= control target key end

     0   :  { %v221_v0 = vmov 0.0|0.0   ;;  %vm222_vm0 = vmmov 0   ;;  %v223_v6 = vmov 0.0   ;;  %vm32_vm1 = vcmask 523264   ;;  %s322_s1 = inlined_call_operand.vmem [shape: f32[64,32], index: 1, kind: input, shape index: {}]   ;;  %s323_s0 = inlined_call_operand.vmem [shape: f32[34,64], index: 0, kind: input, shape index: {}]   ;;  %s324_s2 = inlined_call_operand.vmem [shape: f32[34,32], index: 2, kind: input, shape index: {}]   ;;  %s325_s3 = inlined_call_operand.vmem [shape: f32[34,32], index: 3, kind: output, shape index: {}]  }
   0x1   :  { %198 = vmatprep.subr.bf16.mxu0 %v221_v0  ;;  %v19_v1 = vld [vmem:[%s322_s1] sm:$0xff]  ;;  %v20_v2 = vld [vmem:[%s322_s1 + $0x8] sm:$0xff]  ;;  %210 = vmatprep.subr.bf16.mxu1 %v221_v0  ;;  %v21_v3 = vld [vmem:[%s322_s1 + $0x10] sm:$0xff]  ;;  %vm138_vm2 = vcmask 261120   ;;  %vm143_vm3 = vcmask 254976  }
   0x2   :  { %v199_v4 = vpack.c.bf16 %v20_v2, %v19_v1  ;;  %v22_v5 = vld [vmem:[%s322_s1 + $0x18] sm:$0xff]  ;;  %183 = vmatprep.mubr.msk.f32.mxu0 %vm222_vm0, %v223_v6  ;;  %192 = vmatprep.mubr.msk.f32.mxu1 %vm222_vm0, %v223_v6  ;;  %v23_v8 = vld [vmem:[%s322_s1 + $0x20] sm:$0xff]  ;;  %v24_v9 = vld [vmem:[%s322_s1 + $0x28] sm:$0xff] }
   0x3   :  { %v202_v7 = vpack.c.bf16 %v22_v5, %v21_v3  ;;  %v205_v10 = vpack.c.bf16 %v24_v9, %v23_v8  ;;  %v25_v11 = vld [vmem:[%s322_s1 + $0x30] sm:$0xff]  ;;  %v26_v12 = vld [vmem:[%s322_s1 + $0x38] sm:$0xff]  ;;  %v14_v14 = vld [vmem:[%s323_s0] sm:$0xff] }
   0x4   :  { %200 = vmatpush3.bf16.msra.mxu0 %v199_v4  ;;  %214 = vmatpush3.bf16.msra.mxu1 %v199_v4  ;;  %v208_v13 = vpack.c.bf16 %v26_v12, %v25_v11  ;;  %v17_v15 = vld [vmem:[%s323_s0 + $0x18] sm:$0xff]  ;;  %v15_v16 = vld [vmem:[%s323_s0 + $0x8] sm:$0xff]  ;;  %v18_v17 = vld [vmem:[%s323_s0 + $0x20] sm:$0x3] }
   0x5   :  { %201 = vmatprep.subr.bf16.mxu0 %v221_v0  ;;  %211 = vmatprep.subr.bf16.mxu1 %v221_v0  ;;  %v16_v18 = vld [vmem:[%s323_s0 + $0x10] sm:$0xff]  ;;  %v27_v19 = vld [vmem:[%s324_s2] sm:$0xff]  ;;  %v30_v20 = vld [vmem:[%s324_s2 + $0x18] sm:$0xff] }
   0x6   :  { %v28_v27 = vld [vmem:[%s324_s2 + $0x8] sm:$0xff]  ;;  %v31_v28 = vld [vmem:[%s324_s2 + $0x20] sm:$0x3]  ;;  %v29_v35 = vld [vmem:[%s324_s2 + $0x10] sm:$0xff] }
   0x8   :  { %203 = vmatpush3.bf16.msra.mxu0 %v202_v7  ;;  %215 = vmatpush3.bf16.msra.mxu1 %v202_v7 }
   0x9   :  { %204 = vmatprep.subr.bf16.mxu0 %v221_v0  ;;  %212 = vmatprep.subr.bf16.mxu1 %v221_v0 }
   0xc   :  { %206 = vmatpush3.bf16.msra.mxu0 %v205_v10  ;;  %216 = vmatpush3.bf16.msra.mxu1 %v205_v10 }
   0xd   :  { %207 = vmatprep.subr.bf16.mxu0 %v221_v0  ;;  %213 = vmatprep.subr.bf16.mxu1 %v221_v0 }
  0x10   :  { %209 = vmatpush3.bf16.msra.mxu0 %v208_v13  ;;  %217 = vmatpush3.bf16.msra.mxu1 %v208_v13 }
  0x13   :  { %184 = vmatmul.mubr.msk.f32.vlgmr.msra.gmra.mrb[0].mxu0 %vm32_vm1, %v14_v14  ;;  %193 = vmatmul.mubr.msk.f32.vlgmr.msra.gmra.mrb[0].mxu1 %vm32_vm1, %v17_v15 }
  0x14   :  { %186 = vmatprep.mubr.msk.f32.mxu0 %vm222_vm0, %v223_v6  ;;  %195 = vmatprep.mubr.msk.f32.mxu1 %vm222_vm0, %v223_v6 }
  0x17   :  { %187 = vmatmul.mubr.msk.f32.gmra.mrb[2].mxu0 %vm32_vm1, %v15_v16  ;;  %196 = vmatmul.mubr.msk.f32.gmra.mrb[2].mxu1 %vm32_vm1, %v18_v17 }
  0x18   :  { %189 = vmatprep.mubr.msk.f32.mxu0 %vm222_vm0, %v223_v6 }
  0x1b   :  { %190 = vmatmul.mubr.msk.f32.gmra.mrb[4].mxu0 %vm32_vm1, %v16_v18 }
  0xe6   :  { %v114_v21 = vpop.f32.mrb[0].mxu0  ;;  %v129_v22 = vpop.f32.mrb[0].mxu1 }
  0xe7   :  { %v115_v23 = vadd.f32 %v114_v21, %v27_v19  ;;  %v185_v24 = vpop.f32.mrb[1].mxu0  ;;  %v130_v25 = vadd.f32 %v129_v22, %v30_v20  ;;  %v194_v26 = vpop.f32.mrb[1].mxu1 }
  0xe9   :  { %139 = vst.msk [vmem:[%s325_s3] sm:$0xff] %vm138_vm2, %v115_v23  ;;  %142 = vst.msk [vmem:[%s325_s3 + $0x18] sm:$0xff] %vm138_vm2, %v130_v25 }
  0xea   :  { %v119_v29 = vpop.f32.mrb[2].mxu0  ;;  %v134_v30 = vpop.f32.mrb[2].mxu1 }
  0xeb   :  { %v120_v31 = vadd.f32 %v119_v29, %v28_v27  ;;  %v188_v32 = vpop.f32.mrb[3].mxu0  ;;  %v135_v33 = vadd.f32 %v134_v30, %v31_v28  ;;  %v197_v34 = vpop.f32.mrb[3].mxu1 }
  0xed   :  { %140 = vst.msk [vmem:[%s325_s3 + $0x8] sm:$0xff] %vm138_vm2, %v120_v31 }
  0xee   :  { %144 = vst.msk [vmem:[%s325_s3 + $0x20] sm:$0x3] %vm143_vm3, %v135_v33  ;;  %v124_v36 = vpop.f32.mrb[4].mxu0 }
  0xef   :  { %v125_v37 = vadd.f32 %v124_v36, %v29_v35  ;;  %v191_v38 = vpop.f32.mrb[5].mxu0 }
  0xf1   :  { %141 = vst.msk [vmem:[%s325_s3 + $0x10] sm:$0xff] %vm138_vm2, %v125_v37 }

</bundles_post_ra>
